<compile_context>
chip_gen: v7x
topology: tpu7x:2x2x1
jax: 0.10.0
libtpu: 0.0.40
codegen_flags: <defaults>
</compile_context>

<pallas_src>
import math

import jax
import jax.numpy as jnp
from jax.experimental import pallas as pl
from jax.experimental.pallas import tpu as pltpu

RMS_EPS = 1e-6      # RMSNorm eps
LN_EPS = 1e-5       # nn.LayerNorm default eps

# Perf review (v6e): tanh-GELU runs on the EUP (a VLIW slot that is idle under
# the MXU) instead of a long erf VPU polynomial.
# TODO(synk): set to False if exact-erf parity with torch nn.GELU is required.
GELU_APPROX = True

# Perf review: feed the MXU bf16 operands, accumulate in f32.
MXU_DTYPE = jnp.bfloat16

VMEM_LIMIT = 64 * 1024 * 1024


# ---------------------------------------------------------------------------
# Kernel 1: fused fc1/fc2 branches
#   y_i = GELU( RMSNorm( x_i @ W_i + b_i ) )   on (B*S, D) folded matmuls.
# ---------------------------------------------------------------------------
def _branch_mlp_kernel(x1_ref, x2_ref, w1_ref, b1_ref, g1_ref,
                       w2_ref, b2_ref, g2_ref, o1_ref, o2_ref):
    def one_branch(x_ref, w_ref, b_ref, g_ref, o_ref):
        w = w_ref[...]                                        # (D, D) bf16, resident
        h = jnp.dot(x_ref[...].astype(w.dtype), w,
                    preferred_element_type=jnp.float32)       # f32 accumulation
        h = h + b_ref[...]
        # RMSNorm (row-wise over the feature axis; padded rows are harmless)
        ms = jnp.mean(h * h, axis=-1, keepdims=True)
        h = h * jax.lax.rsqrt(ms + RMS_EPS) * g_ref[...]
        h = jax.nn.gelu(h, approximate=GELU_APPROX)
        o_ref[...] = h.astype(o_ref.dtype)                    # input dtype writeback

    one_branch(x1_ref, w1_ref, b1_ref, g1_ref, o1_ref)
    one_branch(x2_ref, w2_ref, b2_ref, g2_ref, o2_ref)


def branch_mlp(x1, x2, w1, b1, g1, w2, b2, g2):
    # x1, x2: (M, D)   w: (D, D) bf16   b, g: (1, D) f32
    M, D = x1.shape
    tm = M if M <= 512 else 512                 # big mem-bound tiles (review item)
    grid = (pl.cdiv(M, tm),)

    blocked = pl.BlockSpec((tm, D), lambda m: (m, 0))
    # Constant-index operands: whole array resident once in VMEM (single buffer).
    const = pl.BlockSpec(memory_space=pltpu.MemorySpace.VMEM)

    out_dtype = x1.dtype
    return pl.pallas_call(
        _branch_mlp_kernel,
        out_shape=(jax.ShapeDtypeStruct((M, D), out_dtype),
                   jax.ShapeDtypeStruct((M, D), out_dtype)),
        grid=grid,
        in_specs=[blocked, blocked, const, const, const, const, const, const],
        out_specs=(blocked, blocked),
        compiler_params=pltpu.CompilerParams(
            dimension_semantics=("parallel",),
            vmem_limit_bytes=VMEM_LIMIT),
    )(x1, x2, w1, b1, g1, w2, b2, g2)


# ---------------------------------------------------------------------------
# Kernel 2: gate head (whole batch in one gridless call)
#   TransLayer (pre-LN, CLS-query-only) + residual + classifier + DiffSoftmax.
# ---------------------------------------------------------------------------
def _gate_head_kernel(y1_ref, y2_ref, cls_ref, ln_g_ref, ln_b_ref,
                      wq_ref, bq_ref, wk_ref, bk_ref, wv_ref, bv_ref,
                      wo_ref, bo_ref, wc_ref, bc_ref, temp_ref, out_ref):
    B, S, D = y1_ref.shape
    f32 = jnp.float32

    gamma = ln_g_ref[...]
    beta = ln_b_ref[...]

    def layernorm(t):                                         # t: (rows, D) f32
        mu = jnp.mean(t, axis=-1, keepdims=True)
        xc = t - mu
        var = jnp.mean(xc * xc, axis=-1, keepdims=True)
        return xc * jax.lax.rsqrt(var + LN_EPS) * gamma + beta

    cls_tok = cls_ref[...].astype(f32)                        # (1, D)
    y1 = y1_ref[...].astype(f32).reshape(B * S, D)            # carried in input dtype in HBM
    y2 = y2_ref[...].astype(f32).reshape(B * S, D)

    h_cls = layernorm(cls_tok)
    h1 = layernorm(y1)
    h2 = layernorm(y2)

    wdt = wq_ref.dtype                                        # bf16 MXU operands

    def proj(h, w_ref, b_ref):
        return jnp.dot(h.astype(wdt), w_ref[...],
                       preferred_element_type=f32) + b_ref[...]

    # Batched projections: one (B*S, D) @ (D, D) per branch + one CLS row.
    q_cls = proj(h_cls, wq_ref, bq_ref)                       # (1, D) CLS query (shared)
    k_cls = proj(h_cls, wk_ref, bk_ref)                       # (1, D)
    v_cls = proj(h_cls, wv_ref, bv_ref)                       # (1, D)
    k1 = proj(h1, wk_ref, bk_ref).reshape(B, S, D)
    v1 = proj(h1, wv_ref, bv_ref).reshape(B, S, D)
    k2 = proj(h2, wk_ref, bk_ref).reshape(B, S, D)
    v2 = proj(h2, wv_ref, bv_ref).reshape(B, S, D)

    # Token order [cls, fc1(x1), fc2(x2)] assembled in VMEM only (no HBM concat).
    k_all = jnp.concatenate(
        [jnp.broadcast_to(k_cls.reshape(1, 1, D), (B, 1, D)), k1, k2], axis=1)  # (B, L, D)
    v_all = jnp.concatenate(
        [jnp.broadcast_to(v_cls.reshape(1, 1, D), (B, 1, D)), v1, v2], axis=1)  # (B, L, D)

    q = jnp.broadcast_to(q_cls.reshape(1, 1, D), (B, 1, D))
    scores = jnp.einsum('bqd,bkd->bqk', q, k_all,
                        preferred_element_type=f32) * (1.0 / math.sqrt(D))      # (B, 1, L)
    p = jax.nn.softmax(scores, axis=-1)
    attn = jnp.einsum('bqk,bkd->bqd', p, v_all,
                      preferred_element_type=f32).reshape(B, D)                 # (B, D)

    attn = jnp.dot(attn.astype(wdt), wo_ref[...],
                   preferred_element_type=f32) + bo_ref[...]
    cls_out = cls_tok + attn                                   # pre-LN residual, (B, D)

    logits = jnp.dot(cls_out.astype(wdt), wc_ref[...],
                     preferred_element_type=f32) + bc_ref[...]                  # (B, E)
    inv_tau = 1.0 / temp_ref[0]                                # SMEM scalar
    out_ref[...] = jax.nn.softmax(logits * inv_tau, axis=-1).astype(out_ref.dtype)


def gate_head(y1, y2, cls, ln_g, ln_b, wq, bq, wk, bk, wv, bv, wo, bo, wc, bc,
              temp):
    B, S, D = y1.shape
    E = wc.shape[1]
    vmem = pl.BlockSpec(memory_space=pltpu.MemorySpace.VMEM)
    smem = pl.BlockSpec(memory_space=pltpu.MemorySpace.SMEM)
    return pl.pallas_call(
        _gate_head_kernel,
        out_shape=jax.ShapeDtypeStruct((B, E), jnp.float32),
        in_specs=[vmem] * 15 + [smem],
        out_specs=vmem,
        compiler_params=pltpu.CompilerParams(vmem_limit_bytes=VMEM_LIMIT),
    )(y1, y2, cls, ln_g, ln_b, wq, bq, wk, bk, wv, bv, wo, bo, wc, bc, temp)


# ---------------------------------------------------------------------------
# Parameters + full forward
# ---------------------------------------------------------------------------
def init_params(key, dim, branch_num):
    ks = jax.random.split(key, 8)

    def linear(k, fan_in, fan_out):
        bound = 1.0 / math.sqrt(fan_in)
        kw, kb = jax.random.split(k)
        w = jax.random.uniform(kw, (fan_in, fan_out), jnp.float32, -bound, bound)
        b = jax.random.uniform(kb, (fan_out,), jnp.float32, -bound, bound)
        return w, b

    w1, b1 = linear(ks[0], dim, dim)
    w2, b2 = linear(ks[1], dim, dim)
    wq, bq = linear(ks[2], dim, dim)
    wk, bk = linear(ks[3], dim, dim)
    wv, bv = linear(ks[4], dim, dim)
    wo, bo = linear(ks[5], dim, dim)
    wc, bc = linear(ks[6], dim, branch_num)
    return dict(
        w1=w1, b1=b1, g1=jnp.ones((dim,), jnp.float32),
        w2=w2, b2=b2, g2=jnp.ones((dim,), jnp.float32),
        ln_g=jnp.ones((dim,), jnp.float32),
        ln_b=jnp.zeros((dim,), jnp.float32),
        wq=wq, bq=bq, wk=wk, bk=bk, wv=wv, bv=bv, wo=wo, bo=bo,
        cls_pg=jax.random.uniform(ks[7], (1, 1, dim), jnp.float32),  # torch.rand
        wc=wc, bc=bc,
    )


def samlp_gate(params, x1, x2, temp=1.0, hard=False):
    B, S, D = x1.shape
    E = params["wc"].shape[1]
    cdt = MXU_DTYPE

    # --- fused fc1/fc2 branches on the folded (B*S, D) matmul ---
    y1, y2 = branch_mlp(
        x1.reshape(B * S, D), x2.reshape(B * S, D),
        params["w1"].astype(cdt), params["b1"].reshape(1, D), params["g1"].reshape(1, D),
        params["w2"].astype(cdt), params["b2"].reshape(1, D), params["g2"].reshape(1, D))
    y1 = y1.reshape(B, S, D)        # free reshape; no tokens concat in HBM
    y2 = y2.reshape(B, S, D)

    # --- gate head: TransLayer (CLS only) + classifier + soft softmax ---
    temp_arr = jnp.full((1,), temp, jnp.float32)
    y_soft = gate_head(
        y1, y2,
        params["cls_pg"].reshape(1, D),
        params["ln_g"].reshape(1, D), params["ln_b"].reshape(1, D),
        params["wq"].astype(cdt), params["bq"].reshape(1, D),
        params["wk"].astype(cdt), params["bk"].reshape(1, D),
        params["wv"].astype(cdt), params["bv"].reshape(1, D),
        params["wo"].astype(cdt), params["bo"].reshape(1, D),
        params["wc"].astype(cdt), params["bc"].reshape(1, E),
        temp_arr)                                              # (B, E)

    # --- DiffSoftmax hard/soft selection (tiny plain-JAX glue) ---
    if hard:
        idx = jnp.argmax(y_soft, axis=-1)
        y_hard = jax.nn.one_hot(idx, E, dtype=y_soft.dtype)
        ret = y_hard - jax.lax.stop_gradient(y_soft) + y_soft
    else:
        ret = y_soft
    return ret, y_soft


if __name__ == "__main__":
    B, S, D, E = 2, 8, 32, 4
    key = jax.random.PRNGKey(0)
    kp, k1, k2 = jax.random.split(key, 3)

    params = init_params(kp, dim=D, branch_num=E)
    x1 = jax.random.normal(k1, (B, S, D), jnp.float32)
    x2 = jax.random.normal(k2, (B, S, D), jnp.float32)

    logits, y_soft = samlp_gate(params, x1, x2, temp=1.0, hard=False)
    jax.block_until_ready((logits, y_soft))
    print("KERNEL_OK")
</pallas_src>

<mosaic_0001>
module attributes {stable_mosaic.version = 11 : i64} {
  func.func @_branch_mlp_kernel(%arg0: i32, %arg1: memref<16x32xf32, #tpu.memory_space<vmem>>, %arg2: memref<16x32xf32, #tpu.memory_space<vmem>>, %arg3: memref<32x32xbf16, #tpu.memory_space<vmem>>, %arg4: memref<1x32xf32, #tpu.memory_space<vmem>>, %arg5: memref<1x32xf32, #tpu.memory_space<vmem>>, %arg6: memref<32x32xbf16, #tpu.memory_space<vmem>>, %arg7: memref<1x32xf32, #tpu.memory_space<vmem>>, %arg8: memref<1x32xf32, #tpu.memory_space<vmem>>, %arg9: memref<16x32xf32, #tpu.memory_space<vmem>>, %arg10: memref<16x32xf32, #tpu.memory_space<vmem>>) attributes {dimension_semantics = [#tpu.dimension_semantics<parallel>], iteration_bounds = array<i64: 1>, scalar_prefetch = 0 : i64, scratch_operands = 0 : i64, tpu.core_type = #tpu.core_type<tc>, window_params = [{transform_indices = @transform_0, window_bounds = array<i64: 16, 32>}, {transform_indices = @transform_1, window_bounds = array<i64: 16, 32>}, {pipeline_mode = #tpu.pipeline_mode<synchronous>, transform_indices = @transform_2, window_bounds = array<i64: 32, 32>}, {pipeline_mode = #tpu.pipeline_mode<synchronous>, transform_indices = @transform_3, window_bounds = array<i64: 1, 32>}, {pipeline_mode = #tpu.pipeline_mode<synchronous>, transform_indices = @transform_4, window_bounds = array<i64: 1, 32>}, {pipeline_mode = #tpu.pipeline_mode<synchronous>, transform_indices = @transform_5, window_bounds = array<i64: 32, 32>}, {pipeline_mode = #tpu.pipeline_mode<synchronous>, transform_indices = @transform_6, window_bounds = array<i64: 1, 32>}, {pipeline_mode = #tpu.pipeline_mode<synchronous>, transform_indices = @transform_7, window_bounds = array<i64: 1, 32>}, {transform_indices = @transform_8, window_bounds = array<i64: 16, 32>}, {transform_indices = @transform_9, window_bounds = array<i64: 16, 32>}]} {
    %c0 = arith.constant 0 : index
    %c0_0 = arith.constant 0 : index
    %0 = vector.load %arg3[%c0, %c0_0] : memref<32x32xbf16, #tpu.memory_space<vmem>>, vector<32x32xbf16>
    %c0_1 = arith.constant 0 : index
    %c0_2 = arith.constant 0 : index
    %1 = vector.load %arg1[%c0_1, %c0_2] : memref<16x32xf32, #tpu.memory_space<vmem>>, vector<16x32xf32>
    %2 = arith.truncf %1 : vector<16x32xf32> to vector<16x32xbf16>
    %cst = arith.constant dense<0.000000e+00> : vector<16x32xf32>
    %3 = tpu.matmul %2, %0, %cst {dimension_numbers = #tpu.dot_dimension_numbers<[1], [0], [0], [1], [0, 0, 1, 1], [], []>} : vector<16x32xbf16>, vector<32x32xbf16>, vector<16x32xf32> -> vector<16x32xf32>
    %c0_3 = arith.constant 0 : index
    %c0_4 = arith.constant 0 : index
    %4 = vector.load %arg4[%c0_3, %c0_4] : memref<1x32xf32, #tpu.memory_space<vmem>>, vector<1x32xf32>
    %5 = vector.broadcast %4 : vector<1x32xf32> to vector<16x32xf32>
    %6 = arith.addf %3, %5 : vector<16x32xf32>
    %7 = arith.mulf %6, %6 : vector<16x32xf32>
    %cst_5 = arith.constant dense<0.000000e+00> : vector<16xf32>
    %8 = vector.multi_reduction <add>, %7, %cst_5 [1] : vector<16x32xf32> to vector<16xf32>
    %9 = vector.shape_cast %8 : vector<16xf32> to vector<16x1xf32>
    %cst_6 = arith.constant 3.200000e+01 : f32
    %10 = vector.broadcast %cst_6 : f32 to vector<16x1xf32>
    %11 = arith.divf %9, %10 : vector<16x1xf32>
    %cst_7 = arith.constant 9.99999997E-7 : f32
    %12 = vector.broadcast %cst_7 : f32 to vector<16x1xf32>
    %13 = arith.addf %11, %12 : vector<16x1xf32>
    %14 = math.rsqrt %13 : vector<16x1xf32>
    %15 = vector.broadcast %14 : vector<16x1xf32> to vector<16x32xf32>
    %16 = arith.mulf %6, %15 : vector<16x32xf32>
    %c0_8 = arith.constant 0 : index
    %c0_9 = arith.constant 0 : index
    %17 = vector.load %arg5[%c0_8, %c0_9] : memref<1x32xf32, #tpu.memory_space<vmem>>, vector<1x32xf32>
    %18 = vector.broadcast %17 : vector<1x32xf32> to vector<16x32xf32>
    %19 = arith.mulf %16, %18 : vector<16x32xf32>
    %20 = arith.mulf %19, %19 : vector<16x32xf32>
    %21 = arith.mulf %19, %20 : vector<16x32xf32>
    %cst_10 = arith.constant 4.471500e-02 : f32
    %22 = vector.broadcast %cst_10 : f32 to vector<16x32xf32>
    %23 = arith.mulf %22, %21 : vector<16x32xf32>
    %24 = arith.addf %19, %23 : vector<16x32xf32>
    %cst_11 = arith.constant 0.797884583 : f32
    %25 = vector.broadcast %cst_11 : f32 to vector<16x32xf32>
    %26 = arith.mulf %25, %24 : vector<16x32xf32>
    %27 = math.tanh %26 : vector<16x32xf32>
    %cst_12 = arith.constant 1.000000e+00 : f32
    %28 = vector.broadcast %cst_12 : f32 to vector<16x32xf32>
    %29 = arith.addf %28, %27 : vector<16x32xf32>
    %cst_13 = arith.constant 5.000000e-01 : f32
    %30 = vector.broadcast %cst_13 : f32 to vector<16x32xf32>
    %31 = arith.mulf %30, %29 : vector<16x32xf32>
    %32 = arith.mulf %19, %31 : vector<16x32xf32>
    %c0_14 = arith.constant 0 : index
    %c0_15 = arith.constant 0 : index
    %33 = vector.load %arg9[%c0_14, %c0_15] : memref<16x32xf32, #tpu.memory_space<vmem>>, vector<16x32xf32>
    tpu.vector_store %arg9[%c0_14, %c0_15], %32 {strides = array<i32>} : memref<16x32xf32, #tpu.memory_space<vmem>>, vector<16x32xf32>,
    %c0_16 = arith.constant 0 : index
    %c0_17 = arith.constant 0 : index
    %34 = vector.load %arg6[%c0_16, %c0_17] : memref<32x32xbf16, #tpu.memory_space<vmem>>, vector<32x32xbf16>
    %c0_18 = arith.constant 0 : index
    %c0_19 = arith.constant 0 : index
    %35 = vector.load %arg2[%c0_18, %c0_19] : memref<16x32xf32, #tpu.memory_space<vmem>>, vector<16x32xf32>
    %36 = arith.truncf %35 : vector<16x32xf32> to vector<16x32xbf16>
    %cst_20 = arith.constant dense<0.000000e+00> : vector<16x32xf32>
    %37 = tpu.matmul %36, %34, %cst_20 {dimension_numbers = #tpu.dot_dimension_numbers<[1], [0], [0], [1], [0, 0, 1, 1], [], []>} : vector<16x32xbf16>, vector<32x32xbf16>, vector<16x32xf32> -> vector<16x32xf32>
    %c0_21 = arith.constant 0 : index
    %c0_22 = arith.constant 0 : index
    %38 = vector.load %arg7[%c0_21, %c0_22] : memref<1x32xf32, #tpu.memory_space<vmem>>, vector<1x32xf32>
    %39 = vector.broadcast %38 : vector<1x32xf32> to vector<16x32xf32>
    %40 = arith.addf %37, %39 : vector<16x32xf32>
    %41 = arith.mulf %40, %40 : vector<16x32xf32>
    %cst_23 = arith.constant dense<0.000000e+00> : vector<16xf32>
    %42 = vector.multi_reduction <add>, %41, %cst_23 [1] : vector<16x32xf32> to vector<16xf32>
    %43 = vector.shape_cast %42 : vector<16xf32> to vector<16x1xf32>
    %cst_24 = arith.constant 3.200000e+01 : f32
    %44 = vector.broadcast %cst_24 : f32 to vector<16x1xf32>
    %45 = arith.divf %43, %44 : vector<16x1xf32>
    %cst_25 = arith.constant 9.99999997E-7 : f32
    %46 = vector.broadcast %cst_25 : f32 to vector<16x1xf32>
    %47 = arith.addf %45, %46 : vector<16x1xf32>
    %48 = math.rsqrt %47 : vector<16x1xf32>
    %49 = vector.broadcast %48 : vector<16x1xf32> to vector<16x32xf32>
    %50 = arith.mulf %40, %49 : vector<16x32xf32>
    %c0_26 = arith.constant 0 : index
    %c0_27 = arith.constant 0 : index
    %51 = vector.load %arg8[%c0_26, %c0_27] : memref<1x32xf32, #tpu.memory_space<vmem>>, vector<1x32xf32>
    %52 = vector.broadcast %51 : vector<1x32xf32> to vector<16x32xf32>
    %53 = arith.mulf %50, %52 : vector<16x32xf32>
    %54 = arith.mulf %53, %53 : vector<16x32xf32>
    %55 = arith.mulf %53, %54 : vector<16x32xf32>
    %cst_28 = arith.constant 4.471500e-02 : f32
    %56 = vector.broadcast %cst_28 : f32 to vector<16x32xf32>
    %57 = arith.mulf %56, %55 : vector<16x32xf32>
    %58 = arith.addf %53, %57 : vector<16x32xf32>
    %cst_29 = arith.constant 0.797884583 : f32
    %59 = vector.broadcast %cst_29 : f32 to vector<16x32xf32>
    %60 = arith.mulf %59, %58 : vector<16x32xf32>
    %61 = math.tanh %60 : vector<16x32xf32>
    %cst_30 = arith.constant 1.000000e+00 : f32
    %62 = vector.broadcast %cst_30 : f32 to vector<16x32xf32>
    %63 = arith.addf %62, %61 : vector<16x32xf32>
    %cst_31 = arith.constant 5.000000e-01 : f32
    %64 = vector.broadcast %cst_31 : f32 to vector<16x32xf32>
    %65 = arith.mulf %64, %63 : vector<16x32xf32>
    %66 = arith.mulf %53, %65 : vector<16x32xf32>
    %c0_32 = arith.constant 0 : index
    %c0_33 = arith.constant 0 : index
    %67 = vector.load %arg10[%c0_32, %c0_33] : memref<16x32xf32, #tpu.memory_space<vmem>>, vector<16x32xf32>
    tpu.vector_store %arg10[%c0_32, %c0_33], %66 {strides = array<i32>} : memref<16x32xf32, #tpu.memory_space<vmem>>, vector<16x32xf32>,
    return
  }
  func.func @transform_0(%arg0: i32) -> (i32, i32) {
    %c0_i32 = arith.constant 0 : i32
    %c0_i32_0 = arith.constant 0 : i32
    return %arg0, %c0_i32 : i32, i32
  }
  func.func @transform_1(%arg0: i32) -> (i32, i32) {
    %c0_i32 = arith.constant 0 : i32
    %c0_i32_0 = arith.constant 0 : i32
    return %arg0, %c0_i32 : i32, i32
  }
  func.func @transform_2(%arg0: i32) -> (i32, i32) {
    %c0_i32 = arith.constant 0 : i32
    %c0_i32_0 = arith.constant 0 : i32
    %c0_i32_1 = arith.constant 0 : i32
    return %c0_i32, %c0_i32_0 : i32, i32
  }
  func.func @transform_3(%arg0: i32) -> (i32, i32) {
    %c0_i32 = arith.constant 0 : i32
    %c0_i32_0 = arith.constant 0 : i32
    %c0_i32_1 = arith.constant 0 : i32
    return %c0_i32, %c0_i32_0 : i32, i32
  }
  func.func @transform_4(%arg0: i32) -> (i32, i32) {
    %c0_i32 = arith.constant 0 : i32
    %c0_i32_0 = arith.constant 0 : i32
    %c0_i32_1 = arith.constant 0 : i32
    return %c0_i32, %c0_i32_0 : i32, i32
  }
  func.func @transform_5(%arg0: i32) -> (i32, i32) {
    %c0_i32 = arith.constant 0 : i32
    %c0_i32_0 = arith.constant 0 : i32
    %c0_i32_1 = arith.constant 0 : i32
    return %c0_i32, %c0_i32_0 : i32, i32
  }
  func.func @transform_6(%arg0: i32) -> (i32, i32) {
    %c0_i32 = arith.constant 0 : i32
    %c0_i32_0 = arith.constant 0 : i32
    %c0_i32_1 = arith.constant 0 : i32
    return %c0_i32, %c0_i32_0 : i32, i32
  }
  func.func @transform_7(%arg0: i32) -> (i32, i32) {
    %c0_i32 = arith.constant 0 : i32
    %c0_i32_0 = arith.constant 0 : i32
    %c0_i32_1 = arith.constant 0 : i32
    return %c0_i32, %c0_i32_0 : i32, i32
  }
  func.func @transform_8(%arg0: i32) -> (i32, i32) {
    %c0_i32 = arith.constant 0 : i32
    %c0_i32_0 = arith.constant 0 : i32
    return %arg0, %c0_i32 : i32, i32
  }
  func.func @transform_9(%arg0: i32) -> (i32, i32) {
    %c0_i32 = arith.constant 0 : i32
    %c0_i32_0 = arith.constant 0 : i32
    return %arg0, %c0_i32 : i32, i32
  }
}

</mosaic_0001>

<bundles_post_ra>
// kernel: tpu_custom_call.1
= control target key start
LH: loop header
LB: loop body
LE: loop exit
PB: predicated region body
PF: predicated region fallthrough
CT: control target
= control target key end

     0   :  { %15 = vsyncpa [#allocation3], 0  ;;  %s942_s0 = inlined_call_operand.hbm [shape: f32[16,32], index: 0, kind: input, shape index: {}]   ;;  %s943_s1 = inlined_call_operand.hbm [shape: f32[16,32], index: 1, kind: input, shape index: {}]   ;;  %s944_s2 = inlined_call_operand.hbm [shape: bf16[32,32], index: 2, kind: input, shape index: {}]   ;;  %s945_s3 = inlined_call_operand.hbm [shape: f32[1,32], index: 3, kind: input, shape index: {}]   ;;  %s946_s4 = inlined_call_operand.hbm [shape: f32[1,32], index: 4, kind: input, shape index: {}]   ;;  %s947_s5 = inlined_call_operand.hbm [shape: bf16[32,32], index: 5, kind: input, shape index: {}]   ;;  %s948_s6 = inlined_call_operand.hbm [shape: f32[1,32], index: 6, kind: input, shape index: {}]   ;;  %s949_s7 = inlined_call_operand.hbm [shape: f32[1,32], index: 7, kind: input, shape index: {}]   ;;  %s950_s8 = inlined_call_operand.hbm [shape: f32[16,32], index: 8, kind: output, shape index: {0}]   ;;  %s951_s9 = inlined_call_operand.hbm [shape: f32[16,32], index: 9, kind: output, shape index: {1}]  }
   0x1   :  { %16 = vsyncpa [#allocation6], 0 }
   0x2   :  { %17 = vsyncpa [#allocation9], 0 }
   0x3   :  { %18 = vsyncpa [#allocation12], 0 }
   0x4   :  { %19 = vsyncpa [#allocation15], 0 }
   0x5   :  { %20 = vsyncpa [#allocation4], 0 }
   0x6   :  { %21 = vsyncpa [#allocation18], 0  ;;  %s706_s30 = smov [#allocation5]   ;;  %s707_s11 = smov [#allocation8]  }
   0x7   :  { %s39_s10 = sshll.u32 %s706_s30, 4  ;;  %s64_s12 = sshll.u32 %s707_s11, 4  ;;  %s40_s10 = int_to_ptr.vmem [resolvable:$true] %s39_s10  ;;  %s772_s12 = int_to_ptr.vmem [resolvable:$true] %s64_s12 }
   0x8   :  { %s472_s15 = scalar_lea.hbm %s943_s1, 256 }
   0x9   :  { %p473_p0 = scmp.ne.s32.totalorder %s943_s1, %s472_s15  ;;  %p476_p1 = scmp.lt.u32.totalorder %s472_s15, %s943_s1 }
   0xb   :  { %p478_p2 = pnand %p476_p1, %p473_p0 }
   0xd   :  { %481 = shalt.err (!%p478_p2)
}
   0xe   :  { %s482_s20 = scalar_lea.vmem %s40_s10, 256  ;;  %p487_p4 = scmp.lt.s32.totalorder %s40_s10, %s40_s10 }
   0xf   :  { %p483_p3 = scmp.ne.s32.totalorder %s40_s10, %s482_s20  ;;  %p488_p5 = scmp.lt.s32.totalorder %s482_s20, %s482_s20 }
  0x11   :  { %p489_p6 = por %p488_p5, %p487_p4 }
  0x13   :  { %p490_p7 = pnand %p489_p6, %p483_p3 }
  0x15   :  { %493 = shalt.err (!%p490_p7)
}
  0x16   :  { %s708_s21 = smov 128   ;;  %s709_s22 = smov 8  }
  0x17   :  { %45 = dma.hbm_to_vmem [thread:$0]  %s943_s1, 256, %s40_s10, [#allocation6], %s708_s21, %s708_s21, %s709_s22  }
  0x18   :  { %s494_s27 = scalar_lea.hbm %s945_s3, 16 }
  0x19   :  { %p495_p8 = scmp.ne.s32.totalorder %s945_s3, %s494_s27  ;;  %p498_p9 = scmp.lt.u32.totalorder %s494_s27, %s945_s3 }
  0x1b   :  { %p500_p10 = pnand %p498_p9, %p495_p8 }
  0x1d   :  { %503 = shalt.err (!%p500_p10)
}
  0x1e   :  { %s504_s13 = scalar_lea.vmem %s772_s12, 16  ;;  %s508_s1 = scalar_lea.vmem %s772_s12, 32 }
  0x1f   :  { %p505_p11 = scmp.ne.s32.totalorder %s772_s12, %s504_s13  ;;  %p509_p12 = scmp.lt.s32.totalorder %s772_s12, %s772_s12 }
  0x20   :  { %p510_p13 = scmp.lt.s32.totalorder %s508_s1, %s504_s13 }
  0x22   :  { %p511_p0 = por %p510_p13, %p509_p12 }
  0x24   :  { %p512_p1 = pnand %p511_p0, %p505_p11 }
  0x26   :  { %515 = shalt.err (!%p512_p1)
}
  0x27   :  { %67 = dma.hbm_to_vmem [thread:$0]  %s945_s3, 16, %s772_s12, [#allocation9]  }
  0x28   :  { %s710_s15 = smov [#allocation11]   ;;  %s711_s17 = smov [#allocation2]  }
  0x29   :  { %s83_s16 = sshll.u32 %s710_s15, 4  ;;  %s27_s18 = sshll.u32 %s711_s17, 4  ;;  %s84_s16 = int_to_ptr.vmem [resolvable:$true] %s83_s16  ;;  %s807_s18 = int_to_ptr.vmem [resolvable:$true] %s27_s18 }
  0x2a   :  { %s516_s23 = scalar_lea.hbm %s947_s5, 256 }
  0x2b   :  { %p517_p2 = scmp.ne.s32.totalorder %s947_s5, %s516_s23  ;;  %p520_p3 = scmp.lt.u32.totalorder %s516_s23, %s947_s5 }
  0x2d   :  { %p522_p4 = pnand %p520_p3, %p517_p2 }
  0x2f   :  { %525 = shalt.err (!%p522_p4)
}
  0x30   :  { %s526_s3 = scalar_lea.vmem %s84_s16, 256  ;;  %p531_p6 = scmp.lt.s32.totalorder %s84_s16, %s84_s16 }
  0x31   :  { %p527_p5 = scmp.ne.s32.totalorder %s84_s16, %s526_s3  ;;  %p532_p7 = scmp.lt.s32.totalorder %s526_s3, %s526_s3 }
  0x33   :  { %p533_p8 = por %p532_p7, %p531_p6 }
  0x35   :  { %p534_p9 = pnand %p533_p8, %p527_p5 }
  0x37   :  { %537 = shalt.err (!%p534_p9)
}
  0x38   :  { %s712_s12 = smov 64   ;;  %s713_s28 = smov 4  }
  0x39   :  { %89 = dma.hbm_to_vmem [thread:$0]  %s947_s5, 256, %s84_s16, [#allocation12], %s712_s12, %s712_s12, %s713_s28  }
  0x3a   :  { %s538_s1 = scalar_lea.hbm %s942_s0, 256 }
  0x3b   :  { %p539_p10 = scmp.ne.s32.totalorder %s942_s0, %s538_s1  ;;  %p542_p11 = scmp.lt.u32.totalorder %s538_s1, %s942_s0 }
  0x3d   :  { %p544_p12 = pnand %p542_p11, %p539_p10 }
  0x3f   :  { %547 = shalt.err (!%p544_p12)
}
  0x40   :  { %s548_s19 = scalar_lea.vmem %s807_s18, 256  ;;  %p553_p0 = scmp.lt.s32.totalorder %s807_s18, %s807_s18 }
  0x41   :  { %p549_p13 = scmp.ne.s32.totalorder %s807_s18, %s548_s19  ;;  %p554_p1 = scmp.lt.s32.totalorder %s548_s19, %s548_s19 }
  0x43   :  { %p555_p2 = por %p554_p1, %p553_p0 }
  0x45   :  { %p556_p3 = pnand %p555_p2, %p549_p13 }
  0x47   :  { %559 = shalt.err (!%p556_p3)
}
  0x48   :  { %33 = dma.hbm_to_vmem [thread:$0]  %s942_s0, 256, %s807_s18, [#allocation3], %s708_s21, %s708_s21, %s709_s22  }
  0x49   :  { %s714_s20 = smov [#allocation7]   ;;  %s715_s24 = smov [#allocation10]  }
  0x4a   :  { %s51_s23 = sshll.u32 %s714_s20, 4  ;;  %s74_s25 = sshll.u32 %s715_s24, 4  ;;  %s52_s23 = int_to_ptr.vmem [resolvable:$true] %s51_s23  ;;  %s75_s25 = int_to_ptr.vmem [resolvable:$true] %s74_s25 }
  0x4b   :  { %s560_s3 = scalar_lea.hbm %s944_s2, 256 }
  0x4c   :  { %p561_p4 = scmp.ne.s32.totalorder %s944_s2, %s560_s3  ;;  %p564_p5 = scmp.lt.u32.totalorder %s560_s3, %s944_s2 }
  0x4e   :  { %p566_p6 = pnand %p564_p5, %p561_p4 }
  0x50   :  { %569 = shalt.err (!%p566_p6)
}
  0x51   :  { %s570_s0 = scalar_lea.vmem %s52_s23, 256  ;;  %p575_p8 = scmp.lt.s32.totalorder %s52_s23, %s52_s23 }
  0x52   :  { %p571_p7 = scmp.ne.s32.totalorder %s52_s23, %s570_s0  ;;  %p576_p9 = scmp.lt.s32.totalorder %s570_s0, %s570_s0 }
  0x54   :  { %p577_p10 = por %p576_p9, %p575_p8 }
  0x56   :  { %p578_p11 = pnand %p577_p10, %p571_p7 }
  0x58   :  { %581 = shalt.err (!%p578_p11)
}
  0x59   :  { %57 = dma.hbm_to_vmem [thread:$0]  %s944_s2, 256, %s52_s23, [#allocation6], %s712_s12, %s712_s12, %s713_s28  }
  0x5a   :  { %s582_s15 = scalar_lea.hbm %s946_s4, 16 }
  0x5b   :  { %p583_p12 = scmp.ne.s32.totalorder %s946_s4, %s582_s15  ;;  %p586_p13 = scmp.lt.u32.totalorder %s582_s15, %s946_s4 }
  0x5d   :  { %p588_p0 = pnand %p586_p13, %p583_p12 }
  0x5f   :  { %591 = shalt.err (!%p588_p0)
}
  0x60   :  { %s592_s20 = scalar_lea.vmem %s75_s25, 16  ;;  %s596_s24 = scalar_lea.vmem %s75_s25, 32 }
  0x61   :  { %p593_p1 = scmp.ne.s32.totalorder %s75_s25, %s592_s20  ;;  %p597_p2 = scmp.lt.s32.totalorder %s75_s25, %s75_s25 }
  0x62   :  { %p598_p3 = scmp.lt.s32.totalorder %s596_s24, %s592_s20 }
  0x64   :  { %p599_p4 = por %p598_p3, %p597_p2 }
  0x66   :  { %p600_p5 = pnand %p599_p4, %p593_p1 }
  0x68   :  { %603 = shalt.err (!%p600_p5)
}
  0x69   :  { %77 = dma.hbm_to_vmem [thread:$0]  %s946_s4, 16, %s75_s25, [#allocation9]  }
  0x6a   :  { %s716_s28 = smov [#allocation13]   ;;  %s717_s26 = smov [#allocation14]  }
  0x6b   :  { %s96_s23 = sshll.u32 %s716_s28, 4  ;;  %s106_s27 = sshll.u32 %s717_s26, 4  ;;  %s97_s23 = int_to_ptr.vmem [resolvable:$true] %s96_s23  ;;  %s107_s27 = int_to_ptr.vmem [resolvable:$true] %s106_s27 }
  0x6c   :  { %s604_s30 = scalar_lea.hbm %s948_s6, 16 }
  0x6d   :  { %p605_p6 = scmp.ne.s32.totalorder %s948_s6, %s604_s30  ;;  %p608_p7 = scmp.lt.u32.totalorder %s604_s30, %s948_s6 }
  0x6f   :  { %p610_p8 = pnand %p608_p7, %p605_p6 }
  0x71   :  { %613 = shalt.err (!%p610_p8)
}
  0x72   :  { %s614_s4 = scalar_lea.vmem %s97_s23, 16  ;;  %s618_s25 = scalar_lea.vmem %s97_s23, 32 }
  0x73   :  { %p615_p9 = scmp.ne.s32.totalorder %s97_s23, %s614_s4  ;;  %p619_p10 = scmp.lt.s32.totalorder %s97_s23, %s97_s23 }
  0x74   :  { %p620_p11 = scmp.lt.s32.totalorder %s618_s25, %s614_s4 }
  0x76   :  { %p621_p12 = por %p620_p11, %p619_p10 }
  0x78   :  { %p622_p13 = pnand %p621_p12, %p615_p9 }
  0x7a   :  { %625 = shalt.err (!%p622_p13)
}
  0x7b   :  { %99 = dma.hbm_to_vmem [thread:$0]  %s948_s6, 16, %s97_s23, [#allocation12]  }
  0x7c   :  { %s626_s17 = scalar_lea.hbm %s949_s7, 16 }
  0x7d   :  { %p627_p0 = scmp.ne.s32.totalorder %s949_s7, %s626_s17  ;;  %p630_p1 = scmp.lt.u32.totalorder %s626_s17, %s949_s7 }
  0x7f   :  { %p632_p2 = pnand %p630_p1, %p627_p0 }
  0x81   :  { %635 = shalt.err (!%p632_p2)
}
  0x82   :  { %s636_s24 = scalar_lea.vmem %s107_s27, 16  ;;  %s640_s2 = scalar_lea.vmem %s107_s27, 32 }
  0x83   :  { %p637_p3 = scmp.ne.s32.totalorder %s107_s27, %s636_s24  ;;  %p641_p4 = scmp.lt.s32.totalorder %s107_s27, %s107_s27 }
  0x84   :  { %p642_p5 = scmp.lt.s32.totalorder %s640_s2, %s636_s24 }
  0x86   :  { %p643_p6 = por %p642_p5, %p641_p4 }
  0x88   :  { %p644_p7 = pnand %p643_p6, %p637_p3 }
  0x8a   :  { %647 = shalt.err (!%p644_p7)
}
  0x8b   :  { %109 = dma.hbm_to_vmem [thread:$0]  %s949_s7, 16, %s107_s27, [#allocation15]  }
  0x8c   :  { %692 = dma.done.wait [#allocation3], 256  }
  0x8d   :  { %693 = vsyncadd [#allocation3], 4294967040 }
  0x8e   :  { %694 = dma.done.wait [#allocation6], 512  }
  0x8f   :  { %695 = vsyncadd [#allocation6], 4294966784 }
  0x90   :  { %696 = dma.done.wait [#allocation9], 32  }
  0x91   :  { %697 = vsyncadd [#allocation9], 4294967264 }
  0x92   :  { %698 = dma.done.wait [#allocation12], 272  }
  0x93   :  { %699 = vsyncadd [#allocation12], 4294967024 }
  0x94   :  { %700 = dma.done.wait [#allocation15], 16  }
  0x95   :  { %701 = vsyncadd [#allocation15], 4294967280  ;;  %v718_v0 = vmov 0.0   ;;  %vm719_vm0 = vmmov 0   ;;  %v452_v1 = vld [vmem:[#allocation7] sm:$0xff]   ;;  %v453_v2 = vld [vmem:[#allocation11] sm:$0xff]  }
  0x96   :  { %420 = vmatprep.subr.bf16.mxu0 %v718_v0  ;;  %428 = vmatprep.subr.bf16.mxu1 %v718_v0  ;;  %v454_v3 = vld [vmem:[#allocation7 + $0x8] sm:$0xff]   ;;  %v455_v4 = vld [vmem:[#allocation11 + $0x8] sm:$0xff]   ;;  %v256_v7 = vld [vmem:[#allocation5] sm:$0xff]  ;;  %vm161_vm1 = vcmask 261120   ;;  %s720_s7 = smov [#allocation16]   ;;  %s721_s23 = smov [#allocation17]  }
  0x97   :  { %424 = vmatprep.mubr.msk.bf16.mxu0 %vm719_vm0, %v718_v0  ;;  %432 = vmatprep.mubr.msk.bf16.mxu1 %vm719_vm0, %v718_v0  ;;  %v139_v5 = vld [vmem:[#allocation2] sm:$0xff]  ;;  %v140_v6 = vld [vmem:[#allocation2 + $0x8] sm:$0xff]  ;;  %v257_v9 = vld [vmem:[#allocation5 + $0x8] sm:$0xff]  ;;  %s372_s28 = sshll.u32 %s720_s7, 4  ;;  %s384_s26 = sshll.u32 %s721_s23, 4  ;;  %s373_s28 = int_to_ptr.vmem [resolvable:$true] %s372_s28  ;;  %s903_s26 = int_to_ptr.vmem [resolvable:$true] %s384_s26 }
  0x98   :  { %421 = vmatpush3.bf16.msra.mxu0 %v452_v1  ;;  %429 = vmatpush3.bf16.msra.mxu1 %v453_v2  ;;  %v141_v8 = vpack.c.bf16 %v140_v6, %v139_v5  ;;  %v258_v10 = vpack.c.bf16 %v257_v9, %v256_v7  ;;  %v404_v11 = vld [vmem:[#allocation8] ss:$0 sm:$0xff]  ;;  %v409_v12 = vld [vmem:[#allocation13] ss:$0 sm:$0xff]  ;;  %v408_v46 = vld [vmem:[#allocation10] ss:$0 sm:$0xff]  ;;  %p653_p9 = scmp.lt.s32.totalorder %s373_s28, %s373_s28 }
  0x99   :  { %422 = vmatprep.subr.bf16.mxu0 %v718_v0  ;;  %430 = vmatprep.subr.bf16.mxu1 %v718_v0  ;;  %v413_v48 = vld [vmem:[#allocation14] ss:$0 sm:$0xff]  ;;  %s648_s27 = scalar_lea.vmem %s373_s28, 256 }
  0x9a   :  { %p649_p8 = scmp.ne.s32.totalorder %s373_s28, %s648_s27  ;;  %p654_p10 = scmp.lt.s32.totalorder %s648_s27, %s648_s27 }
  0x9c   :  { %423 = vmatpush3.bf16.msra.mxu0 %v454_v3  ;;  %431 = vmatpush3.bf16.msra.mxu1 %v455_v4  ;;  %p655_p11 = por %p654_p10, %p653_p9 }
  0x9e   :  { %p656_p12 = pnand %p655_p11, %p649_p8 }
  0x9f   :  { %425 = vmatmul.mubr.msk.bf16.vlgmr.msra.gmra.mrb[0].mxu0 %vm161_vm1, %v141_v8  ;;  %433 = vmatmul.mubr.msk.bf16.vlgmr.msra.gmra.mrb[0].mxu1 %vm161_vm1, %v258_v10 }
 0x172   :  { %v199_v13 = vpop.f32.mrb[0].mxu0  ;;  %v315_v15 = vpop.f32.mrb[0].mxu1 }
 0x173   :  { %v200_v14 = vadd.f32 %v404_v11, %v199_v13  ;;  %v426_v16 = vpop.f32.mrb[1].mxu0  ;;  %v316_v17 = vadd.f32 %v409_v12, %v315_v15  ;;  %v434_v18 = vpop.f32.mrb[1].mxu1 }
 0x174   :  { %v202_v19 = vpop.f32.mrb[2].mxu0  ;;  %v318_v21 = vpop.f32.mrb[2].mxu1 }
 0x175   :  { %v203_v20 = vadd.f32 %v404_v11, %v202_v19  ;;  %v427_v22 = vpop.f32.mrb[3].mxu0  ;;  %v206_v23 = vmul.f32 %v200_v14, %v200_v14  ;;  %v319_v24 = vadd.f32 %v409_v12, %v318_v21  ;;  %v435_v25 = vpop.f32.mrb[3].mxu1  ;;  %v322_v26 = vmul.f32 %v316_v17, %v316_v17 }
 0x177   :  { %v208_v27 = vsel %vm161_vm1, %v206_v23, 0.0  ;;  %v207_v28 = vmul.f32 %v203_v20, %v203_v20  ;;  %v324_v29 = vsel %vm161_vm1, %v322_v26, 0.0  ;;  %v323_v30 = vmul.f32 %v319_v24, %v319_v24 }
 0x178   :  { %209 = vadd.xlane.f32.xlu0 %v208_v27  ;;  %325 = vadd.xlane.f32.xlu1 %v324_v29 }
 0x179   :  { %v211_v31 = vsel %vm161_vm1, %v207_v28, 0.0  ;;  %v327_v32 = vsel %vm161_vm1, %v323_v30, 0.0 }
 0x17c   :  { %212 = vadd.xlane.f32.xlu0 %v211_v31  ;;  %328 = vadd.xlane.f32.xlu1 %v327_v32 }
 0x205   :  { %v210_v33 = vpop.xlane.xlu0 %209  ;;  %v326_v34 = vpop.xlane.xlu1 %325 }
 0x206   :  { %v215_v35 = vmul.f32 0.03125, %v210_v33  ;;  %v330_v36 = vmul.f32 0.03125, %v326_v34 }
 0x208   :  { %v217_v37 = vadd.f32 1e-06, %v215_v35  ;;  %v332_v38 = vadd.f32 1e-06, %v330_v36 }
 0x209   :  { %v213_v39 = vpop.xlane.xlu0 %212  ;;  %v329_v40 = vpop.xlane.xlu1 %328 }
 0x20a   :  { %456 = vrsqrt.f32 %v217_v37  ;;  %v216_v41 = vmul.f32 0.03125, %v213_v39  ;;  %v331_v42 = vmul.f32 0.03125, %v329_v40 }
 0x20b   :  { %458 = vrsqrt.f32 %v332_v38 }
 0x20c   :  { %v218_v43 = vadd.f32 1e-06, %v216_v41  ;;  %v333_v44 = vadd.f32 1e-06, %v331_v42 }
 0x20e   :  { %460 = vrsqrt.f32 %v218_v43 }
 0x20f   :  { %462 = vrsqrt.f32 %v333_v44 }
 0x214   :  { %v457_v45 = vpop.eup %456 }
 0x215   :  { %v459_v47 = vpop.eup %458  ;;  %v221_v49 = vmul.f32 %v457_v45, %v200_v14 }
 0x216   :  { %v336_v50 = vmul.f32 %v459_v47, %v316_v17 }
 0x217   :  { %v230_v51 = vmul.f32 %v408_v46, %v221_v49 }
 0x218   :  { %v461_v52 = vpop.eup %460  ;;  %v345_v53 = vmul.f32 %v413_v48, %v336_v50 }
 0x219   :  { %v463_v54 = vpop.eup %462  ;;  %v222_v55 = vmul.f32 %v461_v52, %v203_v20  ;;  %v232_v56 = vmul.f32 %v230_v51, %v230_v51 }
 0x21a   :  { %v337_v57 = vmul.f32 %v463_v54, %v319_v24  ;;  %v347_v58 = vmul.f32 %v345_v53, %v345_v53 }
 0x21b   :  { %v231_v59 = vmul.f32 %v408_v46, %v222_v55  ;;  %v234_v60 = vmul.f32 %v232_v56, %v230_v51 }
 0x21c   :  { %v346_v61 = vmul.f32 %v413_v48, %v337_v57  ;;  %v349_v62 = vmul.f32 %v347_v58, %v345_v53 }
 0x21d   :  { %v233_v63 = vmul.f32 %v231_v59, %v231_v59  ;;  %v236_v0 = vmul.f32 0.044715, %v234_v60 }
 0x21e   :  { %v348_v1 = vmul.f32 %v346_v61, %v346_v61  ;;  %v351_v2 = vmul.f32 0.044715, %v349_v62 }
 0x21f   :  { %v235_v3 = vmul.f32 %v233_v63, %v231_v59  ;;  %v238_v4 = vadd.f32 %v236_v0, %v230_v51 }
 0x220   :  { %v350_v5 = vmul.f32 %v348_v1, %v346_v61  ;;  %v353_v6 = vadd.f32 %v351_v2, %v345_v53 }
 0x221   :  { %v237_v7 = vmul.f32 0.044715, %v235_v3  ;;  %v240_v8 = vmul.f32 0.7978846, %v238_v4 }
 0x222   :  { %v352_v9 = vmul.f32 0.044715, %v350_v5  ;;  %v355_v10 = vmul.f32 0.7978846, %v353_v6 }
 0x223   :  { %v239_v11 = vadd.f32 %v237_v7, %v231_v59  ;;  %464 = vtanh.f32 %v240_v8 }
 0x224   :  { %v354_v12 = vadd.f32 %v352_v9, %v346_v61  ;;  %466 = vtanh.f32 %v355_v10 }
 0x225   :  { %v241_v13 = vmul.f32 0.7978846, %v239_v11 }
 0x226   :  { %v356_v14 = vmul.f32 0.7978846, %v354_v12 }
 0x227   :  { %468 = vtanh.f32 %v241_v13 }
 0x228   :  { %470 = vtanh.f32 %v356_v14 }
 0x22d   :  { %v465_v15 = vpop.eup %464 }
 0x22e   :  { %v467_v16 = vpop.eup %466  ;;  %v244_v17 = vadd.f32 1.0, %v465_v15 }
 0x22f   :  { %v359_v18 = vadd.f32 1.0, %v467_v16 }
 0x230   :  { %v246_v19 = vmul.f32 0.5, %v244_v17 }
 0x231   :  { %v469_v20 = vpop.eup %468  ;;  %v361_v21 = vmul.f32 0.5, %v359_v18 }
 0x232   :  { %v471_v22 = vpop.eup %470  ;;  %v245_v23 = vadd.f32 1.0, %v469_v20  ;;  %v248_v24 = vmul.f32 %v246_v19, %v230_v51 }
 0x233   :  { %v360_v25 = vadd.f32 1.0, %v471_v22  ;;  %v363_v26 = vmul.f32 %v361_v21, %v345_v53 }
 0x234   :  { %v247_v27 = vmul.f32 0.5, %v245_v23  ;;  %250 = vst.msk [vmem:[#allocation16] sm:$0xff] %vm161_vm1, %v248_v24 }
 0x235   :  { %v362_v28 = vmul.f32 0.5, %v360_v25  ;;  %365 = vst.msk [vmem:[#allocation17] sm:$0xff] %vm161_vm1, %v363_v26 }
 0x236   :  { %v249_v29 = vmul.f32 %v247_v27, %v231_v59 }
 0x237   :  { %v364_v30 = vmul.f32 %v362_v28, %v346_v61 }
 0x238   :  { %251 = vst.msk [vmem:[#allocation16 + $0x8] sm:$0xff] %vm161_vm1, %v249_v29 }
 0x239   :  { %659 = shalt.err (!%p656_p12)
}
 0x23a   :  { %s660_s30 = scalar_lea.hbm %s950_s8, 256 }
 0x23b   :  { %p661_p13 = scmp.ne.s32.totalorder %s950_s8, %s660_s30  ;;  %p664_p0 = scmp.lt.u32.totalorder %s660_s30, %s950_s8 }
 0x23d   :  { %p666_p1 = pnand %p664_p0, %p661_p13 }
 0x23f   :  { %669 = shalt.err (!%p666_p1)
}
 0x240   :  { %378 = dma.vmem_to_hbm [thread:$0]  %s373_s28, 256, %s950_s8, [#allocation4], %s708_s21, %s708_s21, %s709_s22   ;;  %366 = vst.msk [vmem:[#allocation17 + $0x8] sm:$0xff] %vm161_vm1, %v364_v30 }
 0x241   :  { %s670_s1 = scalar_lea.vmem %s903_s26, 256  ;;  %p675_p3 = scmp.lt.s32.totalorder %s903_s26, %s903_s26 }
 0x242   :  { %p671_p2 = scmp.ne.s32.totalorder %s903_s26, %s670_s1  ;;  %p676_p4 = scmp.lt.s32.totalorder %s670_s1, %s670_s1 }
 0x244   :  { %p677_p5 = por %p676_p4, %p675_p3 }
 0x246   :  { %p678_p6 = pnand %p677_p5, %p671_p2 }
 0x248   :  { %681 = shalt.err (!%p678_p6)
}
 0x249   :  { %s682_s15 = scalar_lea.hbm %s951_s9, 256 }
 0x24a   :  { %p683_p7 = scmp.ne.s32.totalorder %s951_s9, %s682_s15  ;;  %p686_p8 = scmp.lt.u32.totalorder %s682_s15, %s951_s9 }
 0x24c   :  { %p688_p9 = pnand %p686_p8, %p683_p7 }
 0x24e   :  { %691 = shalt.err (!%p688_p9)
}
 0x24f   :  { %390 = dma.vmem_to_hbm [thread:$0]  %s903_s26, 256, %s951_s9, [#allocation18], %s708_s21, %s708_s21, %s709_s22  }
 0x250   :  { %702 = dma.done.wait [#allocation4], 256  }
 0x251   :  { %703 = vsyncadd [#allocation4], 4294967040 }
 0x252   :  { %704 = dma.done.wait [#allocation18], 256  }
 0x253   :  { %705 = vsyncadd [#allocation18], 4294967040 }
 0x254   :  { %397 = vsyncpa [#allocation3], 1 }
 0x255   :  { %398 = vsyncpa [#allocation6], 1 }
 0x256   :  { %399 = vsyncpa [#allocation9], 1 }
 0x257   :  { %400 = vsyncpa [#allocation12], 1 }
 0x258   :  { %401 = vsyncpa [#allocation15], 1 }
 0x259   :  { %402 = vsyncpa [#allocation4], 1 }
 0x25a   :  { %403 = vsyncpa [#allocation18], 1 }

</bundles_post_ra>
